<compile_context>
chip_gen: v7x
topology: tpu7x:2x2x1
jax: 0.10.0
libtpu: 0.0.40
codegen_flags: <defaults>
</compile_context>

<pallas_src>
import math
from functools import partial

import jax
import jax.numpy as jnp
from jax import lax
from jax.experimental import pallas as pl
from jax.experimental.pallas import tpu as pltpu


MATMUL_DTYPE = jnp.bfloat16   # MXU-native on v5e/v6e/v7x; f32 accumulation everywhere
ACT_DTYPE = jnp.bfloat16      # inter-layer activations (halves HBM traffic)
VMEM_LIMIT_BYTES = 32 * 1024 * 1024   # explicit scoped-VMEM cap (raise at real sizes)


# ----------------------------------------------------------------------------
# Pallas kernels
# ----------------------------------------------------------------------------

def _ln_kernel(x_ref, g_ref, b_ref, o_ref, *, eps):
    """Residual-free LayerNorm over the last axis (f32 statistics)."""
    x = x_ref[...].astype(jnp.float32)
    mean = jnp.mean(x, axis=-1, keepdims=True)
    var = jnp.mean(jnp.square(x - mean), axis=-1, keepdims=True)
    y = (x - mean) * lax.rsqrt(var + eps)
    o_ref[...] = (y * g_ref[...] + b_ref[...]).astype(o_ref.dtype)


def layernorm(x, gamma, beta, eps=1e-12, out_dtype=ACT_DTYPE):
    """x: (B, S, D); gamma/beta: (1, D).  Row-tiled over the flattened (B*S, D)."""
    B, S, D = x.shape
    rows = B * S
    x2 = x.reshape(rows, D)
    # 256-row tiles (v6e/v7x sweet spot); the toy problem is a single 16-row tile.
    tile_rows = min(rows, 256)
    out = pl.pallas_call(
        partial(_ln_kernel, eps=eps),
        out_shape=jax.ShapeDtypeStruct((rows, D), out_dtype),
        grid=(pl.cdiv(rows, tile_rows),),
        in_specs=[
            pl.BlockSpec((tile_rows, D), lambda i: (i, 0)),
            pl.BlockSpec((1, D), lambda i: (0, 0)),
            pl.BlockSpec((1, D), lambda i: (0, 0)),
        ],
        out_specs=pl.BlockSpec((tile_rows, D), lambda i: (i, 0)),
        compiler_params=pltpu.CompilerParams(
            dimension_semantics=("parallel",),
            vmem_limit_bytes=VMEM_LIMIT_BYTES),
    )(x2, gamma, beta)
    return out.reshape(B, S, D)


def _encoder_layer_kernel(
    mask_ref, x_ref,
    wqkv_ref, bqkv_ref, wo_ref, bo_ref, ln1g_ref, ln1b_ref,
    w1_ref, b1_ref, w2_ref, b2_ref, ln2g_ref, ln2b_ref,
    o_ref, *, n_heads, head_dim, scale, eps):
    """One full DistilBERT encoder layer for one batch element, all in VMEM.

    Shapes (per block):
      mask_ref : (1, 1, S)  int32 attention mask (1 = attend, 0 = masked)
      x_ref    : (1, S, D)  activations
      wqkv_ref : (D, 3D)    packed [Wq | Wk | Wv] (bf16), per-head column blocks
      bqkv_ref : (1, 3D)    f32
      wo_ref   : (D, D)     output projection (bf16), original layout
      w1/w2    : (D, F) / (F, D) FFN weights (bf16)
    """
    H, Dh = n_heads, head_dim
    x_raw = x_ref[0]                                  # (S, D)
    S, D = x_raw.shape
    x32 = x_raw.astype(jnp.float32)
    xmm = x_raw.astype(wqkv_ref.dtype)

    # ---- fused QKV projection: one lane-dense matmul, N = 3D ----
    qkv = jnp.dot(xmm, wqkv_ref[...],
                  preferred_element_type=jnp.float32) + bqkv_ref[...]   # (S, 3D) f32

    # mask bias computed in-kernel from the int mask
    bias = (1.0 - mask_ref[0].astype(jnp.float32)) * -1e9               # (1, S)

    # ---- scaled masked softmax attention, one head at a time ----
    # Only a single (S, S) f32 score slab is live at any point.
    # TODO(synk): flash-style online-softmax over key tiles once S >= 512.
    ctx_heads = []
    for hd in range(H):
        lo = hd * Dh
        qh = qkv[:, lo:lo + Dh].astype(wqkv_ref.dtype)                  # (S, Dh)
        kh = qkv[:, D + lo:D + lo + Dh].astype(wqkv_ref.dtype)          # (S, Dh)
        vh = qkv[:, 2 * D + lo:2 * D + lo + Dh].astype(wqkv_ref.dtype)  # (S, Dh)
        s = lax.dot_general(qh, kh, (((1,), (1,)), ((), ())),
                            preferred_element_type=jnp.float32) * scale  # (S, S)
        s = s + bias
        s = s - jnp.max(s, axis=-1, keepdims=True)
        p = jnp.exp(s)
        p = p * pl.reciprocal(jnp.sum(p, axis=-1, keepdims=True), approx=True)
        ctx_heads.append(jnp.dot(p.astype(vh.dtype), vh,
                                 preferred_element_type=jnp.float32))    # (S, Dh)
    ctx = jnp.concatenate(ctx_heads, axis=-1)                            # (S, D) f32

    # ---- output projection: head merge folded into one (S, D) @ (D, D) matmul ----
    attn = jnp.dot(ctx.astype(wo_ref.dtype), wo_ref[...],
                   preferred_element_type=jnp.float32) + bo_ref[...]     # (S, D)

    # ---- residual + LayerNorm 1 (f32) ----
    h1 = attn + x32
    mean = jnp.mean(h1, axis=-1, keepdims=True)
    var = jnp.mean(jnp.square(h1 - mean), axis=-1, keepdims=True)
    h1 = (h1 - mean) * lax.rsqrt(var + eps) * ln1g_ref[...] + ln1b_ref[...]

    # ---- FFN: w1 + GELU + w2, (S, F) intermediate never leaves VMEM ----
    # TODO(synk): tile over F with an (S, D) f32 accumulator at real sizes.
    ff = jnp.dot(h1.astype(w1_ref.dtype), w1_ref[...],
                 preferred_element_type=jnp.float32) + b1_ref[...]
    ff = jax.nn.gelu(ff, approximate=True)   # tanh -> EUP slot (erf reference differs slightly)
    ff2 = jnp.dot(ff.astype(w2_ref.dtype), w2_ref[...],
                  preferred_element_type=jnp.float32) + b2_ref[...]

    # ---- residual + LayerNorm 2 (f32) ----
    h2 = ff2 + h1
    mean = jnp.mean(h2, axis=-1, keepdims=True)
    var = jnp.mean(jnp.square(h2 - mean), axis=-1, keepdims=True)
    h2 = (h2 - mean) * lax.rsqrt(var + eps) * ln2g_ref[...] + ln2b_ref[...]

    o_ref[0] = h2.astype(o_ref.dtype)


def encoder_layer(x, attention_mask_3d, layer, cfg, eps=1e-12):
    """x: (B, S, D) activations; attention_mask_3d: (B, 1, S) int32."""
    B, S, D = x.shape
    H = cfg["n_heads"]
    Dh = D // H
    F = cfg["hidden_dim"]
    scale = 1.0 / math.sqrt(Dh)

    def full(shape):
        # grid-invariant block covering the whole array
        # TODO(synk): pipeline_mode=pl.Buffered(1) here at real sizes (v7x VMEM).
        return pl.BlockSpec(shape, lambda b, _s=shape: (0,) * len(_s))

    return pl.pallas_call(
        partial(_encoder_layer_kernel, n_heads=H, head_dim=Dh, scale=scale, eps=eps),
        out_shape=jax.ShapeDtypeStruct((B, S, D), ACT_DTYPE),
        grid=(B,),
        in_specs=[
            pl.BlockSpec((1, 1, S), lambda b: (b, 0, 0)),   # attention mask
            pl.BlockSpec((1, S, D), lambda b: (b, 0, 0)),   # activations
            full((D, 3 * D)),                               # wqkv packed (bf16)
            full((1, 3 * D)),                               # bqkv (f32)
            full((D, D)),                                   # wo   (bf16)
            full((1, D)),                                   # bo
            full((1, D)), full((1, D)),                     # ln1 gamma / beta
            full((D, F)), full((1, F)),                     # w1 / b1
            full((F, D)), full((1, D)),                     # w2 / b2
            full((1, D)), full((1, D)),                     # ln2 gamma / beta
        ],
        out_specs=pl.BlockSpec((1, S, D), lambda b: (b, 0, 0)),
        compiler_params=pltpu.CompilerParams(
            dimension_semantics=("parallel",),
            vmem_limit_bytes=VMEM_LIMIT_BYTES),
    )(attention_mask_3d, x,
      layer["wqkv"], layer["bqkv"], layer["wo"], layer["bo"],
      layer["ln1_g"], layer["ln1_b"],
      layer["w1"], layer["b1"], layer["w2"], layer["b2"],
      layer["ln2_g"], layer["ln2_b"])


# ----------------------------------------------------------------------------
# Synthetic DistilBERT-style parameters (deterministic init, NOT a checkpoint)
# ----------------------------------------------------------------------------

CFG = dict(
    vocab_size=128,
    max_position_embeddings=32,
    dim=32,          # hidden size
    n_heads=4,
    n_layers=2,
    hidden_dim=64,   # FFN intermediate
)


def _dense_init(key, fan_in, fan_out):
    kw, kb = jax.random.split(key)
    w = jax.random.normal(kw, (fan_in, fan_out), jnp.float32) * 0.02
    b = jax.random.normal(kb, (fan_out,), jnp.float32) * 0.02
    return w, b


def init_params(key, cfg):
    D, F, H = cfg["dim"], cfg["hidden_dim"], cfg["n_heads"]
    assert D % H == 0
    keys = jax.random.split(key, 3 + cfg["n_layers"])
    params = dict(
        word_emb=jax.random.normal(keys[0], (cfg["vocab_size"], D), jnp.float32) * 0.02,
        pos_emb=jax.random.normal(keys[1], (cfg["max_position_embeddings"], D), jnp.float32) * 0.02,
        emb_ln_g=jnp.ones((1, D), jnp.float32),
        emb_ln_b=jnp.zeros((1, D), jnp.float32),
    )

    layers = []
    for li in range(cfg["n_layers"]):
        lk = jax.random.split(keys[2 + li], 6)
        wq, bq = _dense_init(lk[0], D, D)
        wk, bk = _dense_init(lk[1], D, D)
        wv, bv = _dense_init(lk[2], D, D)
        wo, bo = _dense_init(lk[3], D, D)
        w1, b1 = _dense_init(lk[4], D, F)
        w2, b2 = _dense_init(lk[5], F, D)
        # Pack [Wq | Wk | Wv] along the output (lane) axis -> (D, 3D).
        # Per-head columns are contiguous within each third, so the kernel can
        # carve Q/K/V per head with static slices.
        wqkv = jnp.concatenate([wq, wk, wv], axis=1)
        bqkv = jnp.concatenate([bq, bk, bv], axis=0).reshape(1, 3 * D)
        layers.append(dict(
            wqkv=wqkv.astype(MATMUL_DTYPE),              # (D, 3D) bf16
            bqkv=bqkv,                                   # (1, 3D) f32
            wo=wo.astype(MATMUL_DTYPE),                  # (D, D) bf16
            bo=bo.reshape(1, D),
            w1=w1.astype(MATMUL_DTYPE), b1=b1.reshape(1, F),
            w2=w2.astype(MATMUL_DTYPE), b2=b2.reshape(1, D),
            ln1_g=jnp.ones((1, D), jnp.float32), ln1_b=jnp.zeros((1, D), jnp.float32),
            ln2_g=jnp.ones((1, D), jnp.float32), ln2_b=jnp.zeros((1, D), jnp.float32),
        ))
    params["layers"] = layers
    fc_w, fc_b = _dense_init(keys[2 + cfg["n_layers"]], D, 1)
    params["fc_w"] = fc_w
    params["fc_b"] = fc_b
    return params


# ----------------------------------------------------------------------------
# Forward pass (mirrors BERTRegression.forward at inference)
# ----------------------------------------------------------------------------

def bert_regression_forward(params, input_ids, attention_mask, cfg=CFG):
    B, S = input_ids.shape

    # --- embeddings (table gather stays in XLA) + row-tiled LayerNorm (Pallas) ---
    # TODO(synk): embedding lookup could become a DMA-gather Pallas kernel; gather
    # has no clean BlockSpec form so it stays in plain JAX.
    positions = jnp.arange(S)
    x = params["word_emb"][input_ids] + params["pos_emb"][positions][None, :, :]
    x = layernorm(x, params["emb_ln_g"], params["emb_ln_b"])          # (B, S, D) bf16

    mask3 = attention_mask.astype(jnp.int32).reshape(B, 1, S)

    # --- transformer layers: one fused Pallas kernel each ---
    for layer in params["layers"]:
        x = encoder_layer(x, mask3, layer, cfg)

    # --- CLS pooling + regression head ---
    cls = x[:, 0, :].astype(jnp.float32)                              # (B, D)
    # dropout: identity at inference (dropout_rate only active in training)
    # 32->1 head: 64 FLOPs, cheaper in plain JAX than a kernel launch w/ masked store
    out = cls @ params["fc_w"] + params["fc_b"]                       # (B, 1)
    return out


# ----------------------------------------------------------------------------
# Main
# ----------------------------------------------------------------------------

if __name__ == "__main__":
    key = jax.random.PRNGKey(0)
    k_param, k_ids = jax.random.split(key)

    params = init_params(k_param, CFG)

    B, S = 2, 8
    input_ids = jax.random.randint(k_ids, (B, S), 0, CFG["vocab_size"], dtype=jnp.int32)
    attention_mask = jnp.ones((B, S), dtype=jnp.int32)

    fwd = jax.jit(partial(bert_regression_forward, cfg=CFG))
    out = fwd(params, input_ids, attention_mask)
    out = jax.block_until_ready(out)

    assert out.shape == (B, 1), out.shape
    assert jnp.all(jnp.isfinite(out))
    print("KERNEL_OK")
</pallas_src>

<mosaic_0001>
module attributes {stable_mosaic.version = 11 : i64} {
  func.func @_ln_kernel(%arg0: i32, %arg1: memref<16x32xf32, #tpu.memory_space<vmem>>, %arg2: memref<1x32xf32, #tpu.memory_space<vmem>>, %arg3: memref<1x32xf32, #tpu.memory_space<vmem>>, %arg4: memref<16x32xbf16, #tpu.memory_space<vmem>>) attributes {dimension_semantics = [#tpu.dimension_semantics<parallel>], iteration_bounds = array<i64: 1>, scalar_prefetch = 0 : i64, scratch_operands = 0 : i64, tpu.core_type = #tpu.core_type<tc>, window_params = [{transform_indices = @transform_0, window_bounds = array<i64: 16, 32>}, {pipeline_mode = #tpu.pipeline_mode<synchronous>, transform_indices = @transform_1, window_bounds = array<i64: 1, 32>}, {pipeline_mode = #tpu.pipeline_mode<synchronous>, transform_indices = @transform_2, window_bounds = array<i64: 1, 32>}, {transform_indices = @transform_3, window_bounds = array<i64: 16, 32>}]} {
    %c0 = arith.constant 0 : index
    %c0_0 = arith.constant 0 : index
    %0 = vector.load %arg1[%c0, %c0_0] : memref<16x32xf32, #tpu.memory_space<vmem>>, vector<16x32xf32>
    %cst = arith.constant dense<0.000000e+00> : vector<16xf32>
    %1 = vector.multi_reduction <add>, %0, %cst [1] : vector<16x32xf32> to vector<16xf32>
    %2 = vector.shape_cast %1 : vector<16xf32> to vector<16x1xf32>
    %cst_1 = arith.constant 3.200000e+01 : f32
    %3 = vector.broadcast %cst_1 : f32 to vector<16x1xf32>
    %4 = arith.divf %2, %3 : vector<16x1xf32>
    %5 = vector.broadcast %4 : vector<16x1xf32> to vector<16x32xf32>
    %6 = arith.subf %0, %5 : vector<16x32xf32>
    %7 = arith.mulf %6, %6 : vector<16x32xf32>
    %cst_2 = arith.constant dense<0.000000e+00> : vector<16xf32>
    %8 = vector.multi_reduction <add>, %7, %cst_2 [1] : vector<16x32xf32> to vector<16xf32>
    %9 = vector.shape_cast %8 : vector<16xf32> to vector<16x1xf32>
    %cst_3 = arith.constant 3.200000e+01 : f32
    %10 = vector.broadcast %cst_3 : f32 to vector<16x1xf32>
    %11 = arith.divf %9, %10 : vector<16x1xf32>
    %12 = vector.broadcast %4 : vector<16x1xf32> to vector<16x32xf32>
    %13 = arith.subf %0, %12 : vector<16x32xf32>
    %cst_4 = arith.constant 9.99999996E-13 : f32
    %14 = vector.broadcast %cst_4 : f32 to vector<16x1xf32>
    %15 = arith.addf %11, %14 : vector<16x1xf32>
    %16 = math.rsqrt %15 : vector<16x1xf32>
    %17 = vector.broadcast %16 : vector<16x1xf32> to vector<16x32xf32>
    %18 = arith.mulf %13, %17 : vector<16x32xf32>
    %c0_5 = arith.constant 0 : index
    %c0_6 = arith.constant 0 : index
    %19 = vector.load %arg2[%c0_5, %c0_6] : memref<1x32xf32, #tpu.memory_space<vmem>>, vector<1x32xf32>
    %20 = vector.broadcast %19 : vector<1x32xf32> to vector<16x32xf32>
    %21 = arith.mulf %18, %20 : vector<16x32xf32>
    %c0_7 = arith.constant 0 : index
    %c0_8 = arith.constant 0 : index
    %22 = vector.load %arg3[%c0_7, %c0_8] : memref<1x32xf32, #tpu.memory_space<vmem>>, vector<1x32xf32>
    %23 = vector.broadcast %22 : vector<1x32xf32> to vector<16x32xf32>
    %24 = arith.addf %21, %23 : vector<16x32xf32>
    %25 = arith.truncf %24 : vector<16x32xf32> to vector<16x32xbf16>
    %c0_9 = arith.constant 0 : index
    %c0_10 = arith.constant 0 : index
    %26 = vector.load %arg4[%c0_9, %c0_10] : memref<16x32xbf16, #tpu.memory_space<vmem>>, vector<16x32xbf16>
    tpu.vector_store %arg4[%c0_9, %c0_10], %25 {strides = array<i32>} : memref<16x32xbf16, #tpu.memory_space<vmem>>, vector<16x32xbf16>,
    return
  }
  func.func @transform_0(%arg0: i32) -> (i32, i32) {
    %c0_i32 = arith.constant 0 : i32
    %c0_i32_0 = arith.constant 0 : i32
    return %arg0, %c0_i32 : i32, i32
  }
  func.func @transform_1(%arg0: i32) -> (i32, i32) {
    %c0_i32 = arith.constant 0 : i32
    %c0_i32_0 = arith.constant 0 : i32
    %c0_i32_1 = arith.constant 0 : i32
    return %c0_i32, %c0_i32_0 : i32, i32
  }
  func.func @transform_2(%arg0: i32) -> (i32, i32) {
    %c0_i32 = arith.constant 0 : i32
    %c0_i32_0 = arith.constant 0 : i32
    %c0_i32_1 = arith.constant 0 : i32
    return %c0_i32, %c0_i32_0 : i32, i32
  }
  func.func @transform_3(%arg0: i32) -> (i32, i32) {
    %c0_i32 = arith.constant 0 : i32
    %c0_i32_0 = arith.constant 0 : i32
    return %arg0, %c0_i32 : i32, i32
  }
}

module attributes {stable_mosaic.version = 11 : i64} {
  func.func @_encoder_layer_kernel(%arg0: i32, %arg1: memref<1x1x8xi32, #tpu.memory_space<vmem>>, %arg2: memref<1x8x32xbf16, #tpu.memory_space<vmem>>, %arg3: memref<32x96xbf16, #tpu.memory_space<vmem>>, %arg4: memref<1x96xf32, #tpu.memory_space<vmem>>, %arg5: memref<32x32xbf16, #tpu.memory_space<vmem>>, %arg6: memref<1x32xf32, #tpu.memory_space<vmem>>, %arg7: memref<1x32xf32, #tpu.memory_space<vmem>>, %arg8: memref<1x32xf32, #tpu.memory_space<vmem>>, %arg9: memref<32x64xbf16, #tpu.memory_space<vmem>>, %arg10: memref<1x64xf32, #tpu.memory_space<vmem>>, %arg11: memref<64x32xbf16, #tpu.memory_space<vmem>>, %arg12: memref<1x32xf32, #tpu.memory_space<vmem>>, %arg13: memref<1x32xf32, #tpu.memory_space<vmem>>, %arg14: memref<1x32xf32, #tpu.memory_space<vmem>>, %arg15: memref<1x8x32xbf16, #tpu.memory_space<vmem>>) attributes {dimension_semantics = [#tpu.dimension_semantics<parallel>], iteration_bounds = array<i64: 2>, scalar_prefetch = 0 : i64, scratch_operands = 0 : i64, tpu.core_type = #tpu.core_type<tc>, window_params = [{transform_indices = @transform_0, window_bounds = array<i64: 1, 1, 8>}, {transform_indices = @transform_1, window_bounds = array<i64: 1, 8, 32>}, {pipeline_mode = #tpu.pipeline_mode<synchronous>, transform_indices = @transform_2, window_bounds = array<i64: 32, 96>}, {pipeline_mode = #tpu.pipeline_mode<synchronous>, transform_indices = @transform_3, window_bounds = array<i64: 1, 96>}, {pipeline_mode = #tpu.pipeline_mode<synchronous>, transform_indices = @transform_4, window_bounds = array<i64: 32, 32>}, {pipeline_mode = #tpu.pipeline_mode<synchronous>, transform_indices = @transform_5, window_bounds = array<i64: 1, 32>}, {pipeline_mode = #tpu.pipeline_mode<synchronous>, transform_indices = @transform_6, window_bounds = array<i64: 1, 32>}, {pipeline_mode = #tpu.pipeline_mode<synchronous>, transform_indices = @transform_7, window_bounds = array<i64: 1, 32>}, {pipeline_mode = #tpu.pipeline_mode<synchronous>, transform_indices = @transform_8, window_bounds = array<i64: 32, 64>}, {pipeline_mode = #tpu.pipeline_mode<synchronous>, transform_indices = @transform_9, window_bounds = array<i64: 1, 64>}, {pipeline_mode = #tpu.pipeline_mode<synchronous>, transform_indices = @transform_10, window_bounds = array<i64: 64, 32>}, {pipeline_mode = #tpu.pipeline_mode<synchronous>, transform_indices = @transform_11, window_bounds = array<i64: 1, 32>}, {pipeline_mode = #tpu.pipeline_mode<synchronous>, transform_indices = @transform_12, window_bounds = array<i64: 1, 32>}, {pipeline_mode = #tpu.pipeline_mode<synchronous>, transform_indices = @transform_13, window_bounds = array<i64: 1, 32>}, {transform_indices = @transform_14, window_bounds = array<i64: 1, 8, 32>}]} {
    %c0 = arith.constant 0 : index
    %c0_0 = arith.constant 0 : index
    %c0_1 = arith.constant 0 : index
    %0 = vector.load %arg2[%c0, %c0_0, %c0_1] : memref<1x8x32xbf16, #tpu.memory_space<vmem>>, vector<1x8x32xbf16>
    %1 = vector.shape_cast %0 : vector<1x8x32xbf16> to vector<8x32xbf16>
    %2 = arith.extf %1 : vector<8x32xbf16> to vector<8x32xf32>
    %c0_2 = arith.constant 0 : index
    %c0_3 = arith.constant 0 : index
    %3 = vector.load %arg3[%c0_2, %c0_3] : memref<32x96xbf16, #tpu.memory_space<vmem>>, vector<32x96xbf16>
    %cst = arith.constant dense<0.000000e+00> : vector<8x96xf32>
    %4 = tpu.matmul %1, %3, %cst {dimension_numbers = #tpu.dot_dimension_numbers<[1], [0], [0], [1], [0, 0, 1, 1], [], []>} : vector<8x32xbf16>, vector<32x96xbf16>, vector<8x96xf32> -> vector<8x96xf32>
    %c0_4 = arith.constant 0 : index
    %c0_5 = arith.constant 0 : index
    %5 = vector.load %arg4[%c0_4, %c0_5] : memref<1x96xf32, #tpu.memory_space<vmem>>, vector<1x96xf32>
    %6 = vector.broadcast %5 : vector<1x96xf32> to vector<8x96xf32>
    %7 = arith.addf %4, %6 : vector<8x96xf32>
    %c0_6 = arith.constant 0 : index
    %c0_7 = arith.constant 0 : index
    %c0_8 = arith.constant 0 : index
    %8 = vector.load %arg1[%c0_6, %c0_7, %c0_8] : memref<1x1x8xi32, #tpu.memory_space<vmem>>, vector<1x1x8xi32>
    %9 = vector.shape_cast %8 : vector<1x1x8xi32> to vector<1x8xi32>
    %10 = arith.sitofp %9 : vector<1x8xi32> to vector<1x8xf32>
    %cst_9 = arith.constant 1.000000e+00 : f32
    %11 = vector.broadcast %cst_9 : f32 to vector<1x8xf32>
    %12 = arith.subf %11, %10 : vector<1x8xf32>
    %cst_10 = arith.constant -1.000000e+09 : f32
    %13 = vector.broadcast %cst_10 : f32 to vector<1x8xf32>
    %14 = arith.mulf %12, %13 : vector<1x8xf32>
    %15 = vector.extract_strided_slice %7 {offsets = [0, 0], sizes = [8, 8], strides = [1, 1]} : vector<8x96xf32> to vector<8x8xf32>
    %16 = arith.truncf %15 : vector<8x8xf32> to vector<8x8xbf16>
    %17 = vector.extract_strided_slice %7 {offsets = [0, 32], sizes = [8, 8], strides = [1, 1]} : vector<8x96xf32> to vector<8x8xf32>
    %18 = arith.truncf %17 : vector<8x8xf32> to vector<8x8xbf16>
    %19 = vector.extract_strided_slice %7 {offsets = [0, 64], sizes = [8, 8], strides = [1, 1]} : vector<8x96xf32> to vector<8x8xf32>
    %20 = arith.truncf %19 : vector<8x8xf32> to vector<8x8xbf16>
    %cst_11 = arith.constant dense<0.000000e+00> : vector<8x8xf32>
    %21 = tpu.matmul %16, %18, %cst_11 {dimension_numbers = #tpu.dot_dimension_numbers<[1], [1], [0], [0], [0, 0, 1, 0], [], []>} : vector<8x8xbf16>, vector<8x8xbf16>, vector<8x8xf32> -> vector<8x8xf32>
    %cst_12 = arith.constant 0.353553385 : f32
    %22 = vector.broadcast %cst_12 : f32 to vector<8x8xf32>
    %23 = arith.mulf %21, %22 : vector<8x8xf32>
    %24 = vector.broadcast %14 : vector<1x8xf32> to vector<8x8xf32>
    %25 = arith.addf %23, %24 : vector<8x8xf32>
    %cst_13 = arith.constant dense<0xFF800000> : vector<8xf32>
    %26 = vector.multi_reduction <maximumf>, %25, %cst_13 [1] : vector<8x8xf32> to vector<8xf32>
    %27 = vector.shape_cast %26 : vector<8xf32> to vector<8x1xf32>
    %28 = vector.broadcast %27 : vector<8x1xf32> to vector<8x8xf32>
    %29 = arith.subf %25, %28 : vector<8x8xf32>
    %30 = math.exp %29 : vector<8x8xf32>
    %cst_14 = arith.constant dense<0.000000e+00> : vector<8xf32>
    %31 = vector.multi_reduction <add>, %30, %cst_14 [1] : vector<8x8xf32> to vector<8xf32>
    %32 = vector.shape_cast %31 : vector<8xf32> to vector<8x1xf32>
    %33 = tpu.reciprocal %32 {approx = true} : vector<8x1xf32> -> vector<8x1xf32>
    %34 = vector.broadcast %33 : vector<8x1xf32> to vector<8x8xf32>
    %35 = arith.mulf %30, %34 : vector<8x8xf32>
    %36 = arith.truncf %35 : vector<8x8xf32> to vector<8x8xbf16>
    %cst_15 = arith.constant dense<0.000000e+00> : vector<8x8xf32>
    %37 = tpu.matmul %36, %20, %cst_15 {dimension_numbers = #tpu.dot_dimension_numbers<[1], [0], [0], [1], [0, 0, 1, 1], [], []>} : vector<8x8xbf16>, vector<8x8xbf16>, vector<8x8xf32> -> vector<8x8xf32>
    %38 = vector.extract_strided_slice %7 {offsets = [0, 8], sizes = [8, 8], strides = [1, 1]} : vector<8x96xf32> to vector<8x8xf32>
    %39 = arith.truncf %38 : vector<8x8xf32> to vector<8x8xbf16>
    %40 = vector.extract_strided_slice %7 {offsets = [0, 40], sizes = [8, 8], strides = [1, 1]} : vector<8x96xf32> to vector<8x8xf32>
    %41 = arith.truncf %40 : vector<8x8xf32> to vector<8x8xbf16>
    %42 = vector.extract_strided_slice %7 {offsets = [0, 72], sizes = [8, 8], strides = [1, 1]} : vector<8x96xf32> to vector<8x8xf32>
    %43 = arith.truncf %42 : vector<8x8xf32> to vector<8x8xbf16>
    %cst_16 = arith.constant dense<0.000000e+00> : vector<8x8xf32>
    %44 = tpu.matmul %39, %41, %cst_16 {dimension_numbers = #tpu.dot_dimension_numbers<[1], [1], [0], [0], [0, 0, 1, 0], [], []>} : vector<8x8xbf16>, vector<8x8xbf16>, vector<8x8xf32> -> vector<8x8xf32>
    %cst_17 = arith.constant 0.353553385 : f32
    %45 = vector.broadcast %cst_17 : f32 to vector<8x8xf32>
    %46 = arith.mulf %44, %45 : vector<8x8xf32>
    %47 = vector.broadcast %14 : vector<1x8xf32> to vector<8x8xf32>
    %48 = arith.addf %46, %47 : vector<8x8xf32>
    %cst_18 = arith.constant dense<0xFF800000> : vector<8xf32>
    %49 = vector.multi_reduction <maximumf>, %48, %cst_18 [1] : vector<8x8xf32> to vector<8xf32>
    %50 = vector.shape_cast %49 : vector<8xf32> to vector<8x1xf32>
    %51 = vector.broadcast %50 : vector<8x1xf32> to vector<8x8xf32>
    %52 = arith.subf %48, %51 : vector<8x8xf32>
    %53 = math.exp %52 : vector<8x8xf32>
    %cst_19 = arith.constant dense<0.000000e+00> : vector<8xf32>
    %54 = vector.multi_reduction <add>, %53, %cst_19 [1] : vector<8x8xf32> to vector<8xf32>
    %55 = vector.shape_cast %54 : vector<8xf32> to vector<8x1xf32>
    %56 = tpu.reciprocal %55 {approx = true} : vector<8x1xf32> -> vector<8x1xf32>
    %57 = vector.broadcast %56 : vector<8x1xf32> to vector<8x8xf32>
    %58 = arith.mulf %53, %57 : vector<8x8xf32>
    %59 = arith.truncf %58 : vector<8x8xf32> to vector<8x8xbf16>
    %cst_20 = arith.constant dense<0.000000e+00> : vector<8x8xf32>
    %60 = tpu.matmul %59, %43, %cst_20 {dimension_numbers = #tpu.dot_dimension_numbers<[1], [0], [0], [1], [0, 0, 1, 1], [], []>} : vector<8x8xbf16>, vector<8x8xbf16>, vector<8x8xf32> -> vector<8x8xf32>
    %61 = vector.extract_strided_slice %7 {offsets = [0, 16], sizes = [8, 8], strides = [1, 1]} : vector<8x96xf32> to vector<8x8xf32>
    %62 = arith.truncf %61 : vector<8x8xf32> to vector<8x8xbf16>
    %63 = vector.extract_strided_slice %7 {offsets = [0, 48], sizes = [8, 8], strides = [1, 1]} : vector<8x96xf32> to vector<8x8xf32>
    %64 = arith.truncf %63 : vector<8x8xf32> to vector<8x8xbf16>
    %65 = vector.extract_strided_slice %7 {offsets = [0, 80], sizes = [8, 8], strides = [1, 1]} : vector<8x96xf32> to vector<8x8xf32>
    %66 = arith.truncf %65 : vector<8x8xf32> to vector<8x8xbf16>
    %cst_21 = arith.constant dense<0.000000e+00> : vector<8x8xf32>
    %67 = tpu.matmul %62, %64, %cst_21 {dimension_numbers = #tpu.dot_dimension_numbers<[1], [1], [0], [0], [0, 0, 1, 0], [], []>} : vector<8x8xbf16>, vector<8x8xbf16>, vector<8x8xf32> -> vector<8x8xf32>
    %cst_22 = arith.constant 0.353553385 : f32
    %68 = vector.broadcast %cst_22 : f32 to vector<8x8xf32>
    %69 = arith.mulf %67, %68 : vector<8x8xf32>
    %70 = vector.broadcast %14 : vector<1x8xf32> to vector<8x8xf32>
    %71 = arith.addf %69, %70 : vector<8x8xf32>
    %cst_23 = arith.constant dense<0xFF800000> : vector<8xf32>
    %72 = vector.multi_reduction <maximumf>, %71, %cst_23 [1] : vector<8x8xf32> to vector<8xf32>
    %73 = vector.shape_cast %72 : vector<8xf32> to vector<8x1xf32>
    %74 = vector.broadcast %73 : vector<8x1xf32> to vector<8x8xf32>
    %75 = arith.subf %71, %74 : vector<8x8xf32>
    %76 = math.exp %75 : vector<8x8xf32>
    %cst_24 = arith.constant dense<0.000000e+00> : vector<8xf32>
    %77 = vector.multi_reduction <add>, %76, %cst_24 [1] : vector<8x8xf32> to vector<8xf32>
    %78 = vector.shape_cast %77 : vector<8xf32> to vector<8x1xf32>
    %79 = tpu.reciprocal %78 {approx = true} : vector<8x1xf32> -> vector<8x1xf32>
    %80 = vector.broadcast %79 : vector<8x1xf32> to vector<8x8xf32>
    %81 = arith.mulf %76, %80 : vector<8x8xf32>
    %82 = arith.truncf %81 : vector<8x8xf32> to vector<8x8xbf16>
    %cst_25 = arith.constant dense<0.000000e+00> : vector<8x8xf32>
    %83 = tpu.matmul %82, %66, %cst_25 {dimension_numbers = #tpu.dot_dimension_numbers<[1], [0], [0], [1], [0, 0, 1, 1], [], []>} : vector<8x8xbf16>, vector<8x8xbf16>, vector<8x8xf32> -> vector<8x8xf32>
    %84 = vector.extract_strided_slice %7 {offsets = [0, 24], sizes = [8, 8], strides = [1, 1]} : vector<8x96xf32> to vector<8x8xf32>
    %85 = arith.truncf %84 : vector<8x8xf32> to vector<8x8xbf16>
    %86 = vector.extract_strided_slice %7 {offsets = [0, 56], sizes = [8, 8], strides = [1, 1]} : vector<8x96xf32> to vector<8x8xf32>
    %87 = arith.truncf %86 : vector<8x8xf32> to vector<8x8xbf16>
    %88 = vector.extract_strided_slice %7 {offsets = [0, 88], sizes = [8, 8], strides = [1, 1]} : vector<8x96xf32> to vector<8x8xf32>
    %89 = arith.truncf %88 : vector<8x8xf32> to vector<8x8xbf16>
    %cst_26 = arith.constant dense<0.000000e+00> : vector<8x8xf32>
    %90 = tpu.matmul %85, %87, %cst_26 {dimension_numbers = #tpu.dot_dimension_numbers<[1], [1], [0], [0], [0, 0, 1, 0], [], []>} : vector<8x8xbf16>, vector<8x8xbf16>, vector<8x8xf32> -> vector<8x8xf32>
    %cst_27 = arith.constant 0.353553385 : f32
    %91 = vector.broadcast %cst_27 : f32 to vector<8x8xf32>
    %92 = arith.mulf %90, %91 : vector<8x8xf32>
    %93 = vector.broadcast %14 : vector<1x8xf32> to vector<8x8xf32>
    %94 = arith.addf %92, %93 : vector<8x8xf32>
    %cst_28 = arith.constant dense<0xFF800000> : vector<8xf32>
    %95 = vector.multi_reduction <maximumf>, %94, %cst_28 [1] : vector<8x8xf32> to vector<8xf32>
    %96 = vector.shape_cast %95 : vector<8xf32> to vector<8x1xf32>
    %97 = vector.broadcast %96 : vector<8x1xf32> to vector<8x8xf32>
    %98 = arith.subf %94, %97 : vector<8x8xf32>
    %99 = math.exp %98 : vector<8x8xf32>
    %cst_29 = arith.constant dense<0.000000e+00> : vector<8xf32>
    %100 = vector.multi_reduction <add>, %99, %cst_29 [1] : vector<8x8xf32> to vector<8xf32>
    %101 = vector.shape_cast %100 : vector<8xf32> to vector<8x1xf32>
    %102 = tpu.reciprocal %101 {approx = true} : vector<8x1xf32> -> vector<8x1xf32>
    %103 = vector.broadcast %102 : vector<8x1xf32> to vector<8x8xf32>
    %104 = arith.mulf %99, %103 : vector<8x8xf32>
    %105 = arith.truncf %104 : vector<8x8xf32> to vector<8x8xbf16>
    %cst_30 = arith.constant dense<0.000000e+00> : vector<8x8xf32>
    %106 = tpu.matmul %105, %89, %cst_30 {dimension_numbers = #tpu.dot_dimension_numbers<[1], [0], [0], [1], [0, 0, 1, 1], [], []>} : vector<8x8xbf16>, vector<8x8xbf16>, vector<8x8xf32> -> vector<8x8xf32>
    %107 = tpu.concatenate %37, %60, %83, %106 in 1 : vector<8x8xf32>, vector<8x8xf32>, vector<8x8xf32>, vector<8x8xf32> -> vector<8x32xf32>
    %108 = arith.truncf %107 : vector<8x32xf32> to vector<8x32xbf16>
    %c0_31 = arith.constant 0 : index
    %c0_32 = arith.constant 0 : index
    %109 = vector.load %arg5[%c0_31, %c0_32] : memref<32x32xbf16, #tpu.memory_space<vmem>>, vector<32x32xbf16>
    %cst_33 = arith.constant dense<0.000000e+00> : vector<8x32xf32>
    %110 = tpu.matmul %108, %109, %cst_33 {dimension_numbers = #tpu.dot_dimension_numbers<[1], [0], [0], [1], [0, 0, 1, 1], [], []>} : vector<8x32xbf16>, vector<32x32xbf16>, vector<8x32xf32> -> vector<8x32xf32>
    %c0_34 = arith.constant 0 : index
    %c0_35 = arith.constant 0 : index
    %111 = vector.load %arg6[%c0_34, %c0_35] : memref<1x32xf32, #tpu.memory_space<vmem>>, vector<1x32xf32>
    %112 = vector.broadcast %111 : vector<1x32xf32> to vector<8x32xf32>
    %113 = arith.addf %110, %112 : vector<8x32xf32>
    %114 = arith.addf %113, %2 : vector<8x32xf32>
    %cst_36 = arith.constant dense<0.000000e+00> : vector<8xf32>
    %115 = vector.multi_reduction <add>, %114, %cst_36 [1] : vector<8x32xf32> to vector<8xf32>
    %116 = vector.shape_cast %115 : vector<8xf32> to vector<8x1xf32>
    %cst_37 = arith.constant 3.200000e+01 : f32
    %117 = vector.broadcast %cst_37 : f32 to vector<8x1xf32>
    %118 = arith.divf %116, %117 : vector<8x1xf32>
    %119 = vector.broadcast %118 : vector<8x1xf32> to vector<8x32xf32>
    %120 = arith.subf %114, %119 : vector<8x32xf32>
    %121 = arith.mulf %120, %120 : vector<8x32xf32>
    %cst_38 = arith.constant dense<0.000000e+00> : vector<8xf32>
    %122 = vector.multi_reduction <add>, %121, %cst_38 [1] : vector<8x32xf32> to vector<8xf32>
    %123 = vector.shape_cast %122 : vector<8xf32> to vector<8x1xf32>
    %cst_39 = arith.constant 3.200000e+01 : f32
    %124 = vector.broadcast %cst_39 : f32 to vector<8x1xf32>
    %125 = arith.divf %123, %124 : vector<8x1xf32>
    %126 = vector.broadcast %118 : vector<8x1xf32> to vector<8x32xf32>
    %127 = arith.subf %114, %126 : vector<8x32xf32>
    %cst_40 = arith.constant 9.99999996E-13 : f32
    %128 = vector.broadcast %cst_40 : f32 to vector<8x1xf32>
    %129 = arith.addf %125, %128 : vector<8x1xf32>
    %130 = math.rsqrt %129 : vector<8x1xf32>
    %131 = vector.broadcast %130 : vector<8x1xf32> to vector<8x32xf32>
    %132 = arith.mulf %127, %131 : vector<8x32xf32>
    %c0_41 = arith.constant 0 : index
    %c0_42 = arith.constant 0 : index
    %133 = vector.load %arg7[%c0_41, %c0_42] : memref<1x32xf32, #tpu.memory_space<vmem>>, vector<1x32xf32>
    %134 = vector.broadcast %133 : vector<1x32xf32> to vector<8x32xf32>
    %135 = arith.mulf %132, %134 : vector<8x32xf32>
    %c0_43 = arith.constant 0 : index
    %c0_44 = arith.constant 0 : index
    %136 = vector.load %arg8[%c0_43, %c0_44] : memref<1x32xf32, #tpu.memory_space<vmem>>, vector<1x32xf32>
    %137 = vector.broadcast %136 : vector<1x32xf32> to vector<8x32xf32>
    %138 = arith.addf %135, %137 : vector<8x32xf32>
    %139 = arith.truncf %138 : vector<8x32xf32> to vector<8x32xbf16>
    %c0_45 = arith.constant 0 : index
    %c0_46 = arith.constant 0 : index
    %140 = vector.load %arg9[%c0_45, %c0_46] : memref<32x64xbf16, #tpu.memory_space<vmem>>, vector<32x64xbf16>
    %cst_47 = arith.constant dense<0.000000e+00> : vector<8x64xf32>
    %141 = tpu.matmul %139, %140, %cst_47 {dimension_numbers = #tpu.dot_dimension_numbers<[1], [0], [0], [1], [0, 0, 1, 1], [], []>} : vector<8x32xbf16>, vector<32x64xbf16>, vector<8x64xf32> -> vector<8x64xf32>
    %c0_48 = arith.constant 0 : index
    %c0_49 = arith.constant 0 : index
    %142 = vector.load %arg10[%c0_48, %c0_49] : memref<1x64xf32, #tpu.memory_space<vmem>>, vector<1x64xf32>
    %143 = vector.broadcast %142 : vector<1x64xf32> to vector<8x64xf32>
    %144 = arith.addf %141, %143 : vector<8x64xf32>
    %145 = arith.mulf %144, %144 : vector<8x64xf32>
    %146 = arith.mulf %144, %145 : vector<8x64xf32>
    %cst_50 = arith.constant 4.471500e-02 : f32
    %147 = vector.broadcast %cst_50 : f32 to vector<8x64xf32>
    %148 = arith.mulf %147, %146 : vector<8x64xf32>
    %149 = arith.addf %144, %148 : vector<8x64xf32>
    %cst_51 = arith.constant 0.797884583 : f32
    %150 = vector.broadcast %cst_51 : f32 to vector<8x64xf32>
    %151 = arith.mulf %150, %149 : vector<8x64xf32>
    %152 = math.tanh %151 : vector<8x64xf32>
    %cst_52 = arith.constant 1.000000e+00 : f32
    %153 = vector.broadcast %cst_52 : f32 to vector<8x64xf32>
    %154 = arith.addf %153, %152 : vector<8x64xf32>
    %cst_53 = arith.constant 5.000000e-01 : f32
    %155 = vector.broadcast %cst_53 : f32 to vector<8x64xf32>
    %156 = arith.mulf %155, %154 : vector<8x64xf32>
    %157 = arith.mulf %144, %156 : vector<8x64xf32>
    %158 = arith.truncf %157 : vector<8x64xf32> to vector<8x64xbf16>
    %c0_54 = arith.constant 0 : index
    %c0_55 = arith.constant 0 : index
    %159 = vector.load %arg11[%c0_54, %c0_55] : memref<64x32xbf16, #tpu.memory_space<vmem>>, vector<64x32xbf16>
    %cst_56 = arith.constant dense<0.000000e+00> : vector<8x32xf32>
    %160 = tpu.matmul %158, %159, %cst_56 {dimension_numbers = #tpu.dot_dimension_numbers<[1], [0], [0], [1], [0, 0, 1, 1], [], []>} : vector<8x64xbf16>, vector<64x32xbf16>, vector<8x32xf32> -> vector<8x32xf32>
    %c0_57 = arith.constant 0 : index
    %c0_58 = arith.constant 0 : index
    %161 = vector.load %arg12[%c0_57, %c0_58] : memref<1x32xf32, #tpu.memory_space<vmem>>, vector<1x32xf32>
    %162 = vector.broadcast %161 : vector<1x32xf32> to vector<8x32xf32>
    %163 = arith.addf %160, %162 : vector<8x32xf32>
    %164 = arith.addf %163, %138 : vector<8x32xf32>
    %cst_59 = arith.constant dense<0.000000e+00> : vector<8xf32>
    %165 = vector.multi_reduction <add>, %164, %cst_59 [1] : vector<8x32xf32> to vector<8xf32>
    %166 = vector.shape_cast %165 : vector<8xf32> to vector<8x1xf32>
    %cst_60 = arith.constant 3.200000e+01 : f32
    %167 = vector.broadcast %cst_60 : f32 to vector<8x1xf32>
    %168 = arith.divf %166, %167 : vector<8x1xf32>
    %169 = vector.broadcast %168 : vector<8x1xf32> to vector<8x32xf32>
    %170 = arith.subf %164, %169 : vector<8x32xf32>
    %171 = arith.mulf %170, %170 : vector<8x32xf32>
    %cst_61 = arith.constant dense<0.000000e+00> : vector<8xf32>
    %172 = vector.multi_reduction <add>, %171, %cst_61 [1] : vector<8x32xf32> to vector<8xf32>
    %173 = vector.shape_cast %172 : vector<8xf32> to vector<8x1xf32>
    %cst_62 = arith.constant 3.200000e+01 : f32
    %174 = vector.broadcast %cst_62 : f32 to vector<8x1xf32>
    %175 = arith.divf %173, %174 : vector<8x1xf32>
    %176 = vector.broadcast %168 : vector<8x1xf32> to vector<8x32xf32>
    %177 = arith.subf %164, %176 : vector<8x32xf32>
    %cst_63 = arith.constant 9.99999996E-13 : f32
    %178 = vector.broadcast %cst_63 : f32 to vector<8x1xf32>
    %179 = arith.addf %175, %178 : vector<8x1xf32>
    %180 = math.rsqrt %179 : vector<8x1xf32>
    %181 = vector.broadcast %180 : vector<8x1xf32> to vector<8x32xf32>
    %182 = arith.mulf %177, %181 : vector<8x32xf32>
    %c0_64 = arith.constant 0 : index
    %c0_65 = arith.constant 0 : index
    %183 = vector.load %arg13[%c0_64, %c0_65] : memref<1x32xf32, #tpu.memory_space<vmem>>, vector<1x32xf32>
    %184 = vector.broadcast %183 : vector<1x32xf32> to vector<8x32xf32>
    %185 = arith.mulf %182, %184 : vector<8x32xf32>
    %c0_66 = arith.constant 0 : index
    %c0_67 = arith.constant 0 : index
    %186 = vector.load %arg14[%c0_66, %c0_67] : memref<1x32xf32, #tpu.memory_space<vmem>>, vector<1x32xf32>
    %187 = vector.broadcast %186 : vector<1x32xf32> to vector<8x32xf32>
    %188 = arith.addf %185, %187 : vector<8x32xf32>
    %189 = arith.truncf %188 : vector<8x32xf32> to vector<8x32xbf16>
    %c0_68 = arith.constant 0 : index
    %c0_69 = arith.constant 0 : index
    %c0_70 = arith.constant 0 : index
    %190 = vector.load %arg15[%c0_68, %c0_69, %c0_70] : memref<1x8x32xbf16, #tpu.memory_space<vmem>>, vector<1x8x32xbf16>
    %191 = vector.shape_cast %190 : vector<1x8x32xbf16> to vector<8x32xbf16>
    %192 = vector.shape_cast %189 : vector<8x32xbf16> to vector<1x8x32xbf16>
    tpu.vector_store %arg15[%c0_68, %c0_69, %c0_70], %192 {strides = array<i32>} : memref<1x8x32xbf16, #tpu.memory_space<vmem>>, vector<1x8x32xbf16>,
    return
  }
  func.func @transform_0(%arg0: i32) -> (i32, i32, i32) {
    %c0_i32 = arith.constant 0 : i32
    %c0_i32_0 = arith.constant 0 : i32
    %c0_i32_1 = arith.constant 0 : i32
    return %arg0, %c0_i32, %c0_i32_0 : i32, i32, i32
  }
  func.func @transform_1(%arg0: i32) -> (i32, i32, i32) {
    %c0_i32 = arith.constant 0 : i32
    %c0_i32_0 = arith.constant 0 : i32
    %c0_i32_1 = arith.constant 0 : i32
    return %arg0, %c0_i32, %c0_i32_0 : i32, i32, i32
  }
  func.func @transform_2(%arg0: i32) -> (i32, i32) {
    %c0_i32 = arith.constant 0 : i32
    %c0_i32_0 = arith.constant 0 : i32
    %c0_i32_1 = arith.constant 0 : i32
    return %c0_i32, %c0_i32_0 : i32, i32
  }
  func.func @transform_3(%arg0: i32) -> (i32, i32) {
    %c0_i32 = arith.constant 0 : i32
    %c0_i32_0 = arith.constant 0 : i32
    %c0_i32_1 = arith.constant 0 : i32
    return %c0_i32, %c0_i32_0 : i32, i32
  }
  func.func @transform_4(%arg0: i32) -> (i32, i32) {
    %c0_i32 = arith.constant 0 : i32
    %c0_i32_0 = arith.constant 0 : i32
    %c0_i32_1 = arith.constant 0 : i32
    return %c0_i32, %c0_i32_0 : i32, i32
  }
  func.func @transform_5(%arg0: i32) -> (i32, i32) {
    %c0_i32 = arith.constant 0 : i32
    %c0_i32_0 = arith.constant 0 : i32
    %c0_i32_1 = arith.constant 0 : i32
    return %c0_i32, %c0_i32_0 : i32, i32
  }
  func.func @transform_6(%arg0: i32) -> (i32, i32) {
    %c0_i32 = arith.constant 0 : i32
    %c0_i32_0 = arith.constant 0 : i32
    %c0_i32_1 = arith.constant 0 : i32
    return %c0_i32, %c0_i32_0 : i32, i32
  }
  func.func @transform_7(%arg0: i32) -> (i32, i32) {
    %c0_i32 = arith.constant 0 : i32
    %c0_i32_0 = arith.constant 0 : i32
    %c0_i32_1 = arith.constant 0 : i32
    return %c0_i32, %c0_i32_0 : i32, i32
  }
  func.func @transform_8(%arg0: i32) -> (i32, i32) {
    %c0_i32 = arith.constant 0 : i32
    %c0_i32_0 = arith.constant 0 : i32
    %c0_i32_1 = arith.constant 0 : i32
    return %c0_i32, %c0_i32_0 : i32, i32
  }
  func.func @transform_9(%arg0: i32) -> (i32, i32) {
    %c0_i32 = arith.constant 0 : i32
    %c0_i32_0 = arith.constant 0 : i32
    %c0_i32_1 = arith.constant 0 : i32
    return %c0_i32, %c0_i32_0 : i32, i32
  }
  func.func @transform_10(%arg0: i32) -> (i32, i32) {
    %c0_i32 = arith.constant 0 : i32
    %c0_i32_0 = arith.constant 0 : i32
    %c0_i32_1 = arith.constant 0 : i32
    return %c0_i32, %c0_i32_0 : i32, i32
  }
  func.func @transform_11(%arg0: i32) -> (i32, i32) {
    %c0_i32 = arith.constant 0 : i32
    %c0_i32_0 = arith.constant 0 : i32
    %c0_i32_1 = arith.constant 0 : i32
    return %c0_i32, %c0_i32_0 : i32, i32
  }
  func.func @transform_12(%arg0: i32) -> (i32, i32) {
    %c0_i32 = arith.constant 0 : i32
    %c0_i32_0 = arith.constant 0 : i32
    %c0_i32_1 = arith.constant 0 : i32
    return %c0_i32, %c0_i32_0 : i32, i32
  }
  func.func @transform_13(%arg0: i32) -> (i32, i32) {
    %c0_i32 = arith.constant 0 : i32
    %c0_i32_0 = arith.constant 0 : i32
    %c0_i32_1 = arith.constant 0 : i32
    return %c0_i32, %c0_i32_0 : i32, i32
  }
  func.func @transform_14(%arg0: i32) -> (i32, i32, i32) {
    %c0_i32 = arith.constant 0 : i32
    %c0_i32_0 = arith.constant 0 : i32
    %c0_i32_1 = arith.constant 0 : i32
    return %arg0, %c0_i32, %c0_i32_0 : i32, i32, i32
  }
}

</mosaic_0001>

<bundles_post_ra>
// kernel: bert_regression_forward.3
= control target key start
LH: loop header
LB: loop body
LE: loop exit
PB: predicated region body
PF: predicated region fallthrough
CT: control target
= control target key end

     0   :  { %vm16_vm0 = vcmask 261120   ;;  %vm70_vm1 = vcmask 257024   ;;  %s129_s0 = inlined_call_operand.vmem [shape: f32[16,32], index: 0, kind: input, shape index: {}]   ;;  %s130_s1 = inlined_call_operand.vmem [shape: f32[1,32], index: 1, kind: input, shape index: {}]   ;;  %s131_s2 = inlined_call_operand.vmem [shape: f32[1,32], index: 2, kind: input, shape index: {}]   ;;  %s132_s3 = inlined_call_operand.vmem [shape: bf16[16,32], index: 3, kind: output, shape index: {}]  }
   0x1   :  { %v14_v0 = vld [vmem:[%s129_s0] sm:$0xff]  ;;  %v15_v1 = vld [vmem:[%s129_s0 + $0x8] sm:$0xff] }
   0x2   :  { %v17_v2 = vsel %vm16_vm0, %v14_v0, 0.0  ;;  %v20_v3 = vsel %vm16_vm0, %v15_v1, 0.0  ;;  %v77_v21 = vld [vmem:[%s130_s1] ss:$0 sm:$0xff] }
   0x3   :  { %18 = vadd.xlane.f32.xlu0 %v17_v2  ;;  %v78_v23 = vld [vmem:[%s131_s2] ss:$0 sm:$0xff] }
   0x7   :  { %21 = vadd.xlane.f32.xlu0 %v20_v3 }
  0x90   :  { %v19_v4 = vpop.xlane.xlu0 %18 }
  0x91   :  { %v24_v5 = vmul.f32 0.03125, %v19_v4 }
  0x93   :  { %v26_v6 = vsub.f32 %v14_v0, %v24_v5 }
  0x94   :  { %v22_v7 = vpop.xlane.xlu0 %21 }
  0x95   :  { %v25_v8 = vmul.f32 0.03125, %v22_v7  ;;  %v28_v9 = vmul.f32 %v26_v6, %v26_v6 }
  0x97   :  { %v27_v10 = vsub.f32 %v15_v1, %v25_v8  ;;  %v30_v11 = vsel %vm16_vm0, %v28_v9, 0.0 }
  0x98   :  { %31 = vadd.xlane.f32.xlu1 %v30_v11 }
  0x99   :  { %v29_v12 = vmul.f32 %v27_v10, %v27_v10 }
  0x9b   :  { %v33_v13 = vsel %vm16_vm0, %v29_v12, 0.0 }
  0x9c   :  { %34 = vadd.xlane.f32.xlu1 %v33_v13 }
 0x125   :  { %v32_v14 = vpop.xlane.xlu1 %31 }
 0x126   :  { %v36_v15 = vmul.f32 0.03125, %v32_v14 }
 0x128   :  { %v38_v16 = vadd.f32 1e-12, %v36_v15 }
 0x129   :  { %v35_v17 = vpop.xlane.xlu1 %34 }
 0x12a   :  { %83 = vrsqrt.f32 %v38_v16  ;;  %v37_v18 = vmul.f32 0.03125, %v35_v17 }
 0x12c   :  { %v39_v19 = vadd.f32 1e-12, %v37_v18 }
 0x12e   :  { %85 = vrsqrt.f32 %v39_v19 }
 0x134   :  { %v84_v20 = vpop.eup %83 }
 0x135   :  { %v42_v22 = vmul.f32 %v84_v20, %v26_v6 }
 0x137   :  { %v51_v24 = vmul.f32 %v77_v21, %v42_v22 }
 0x138   :  { %v86_v25 = vpop.eup %85 }
 0x139   :  { %v60_v26 = vadd.f32 %v78_v23, %v51_v24  ;;  %v43_v27 = vmul.f32 %v86_v25, %v27_v10 }
 0x13b   :  { %v81_v28 = vpack.c.bf16 %v60_v26, %v60_v26  ;;  %v52_v29 = vmul.f32 %v77_v21, %v43_v27 }
 0x13d   :  { %71 = vst.msk [vmem:[%s132_s3] sm:$0xf] %vm70_vm1, %v81_v28  ;;  %v61_v30 = vadd.f32 %v78_v23, %v52_v29 }
 0x13f   :  { %v82_v31 = vpack.c.bf16 %v61_v30, %v61_v30 }
 0x141   :  { %72 = vst.msk [vmem:[%s132_s3 + $0x4] sm:$0xf] %vm70_vm1, %v82_v31 }

// kernel: bert_regression_forward.4
= control target key start
LH: loop header
LB: loop body
LE: loop exit
PB: predicated region body
PF: predicated region fallthrough
CT: control target
= control target key end

     0   :  { %s1685_s29 = smov 0   ;;  %s1859_s0 = inlined_call_operand.vmem [shape: s32[2,1,8], index: 0, kind: input, shape index: {}]   ;;  %s1860_s1 = inlined_call_operand.vmem [shape: bf16[2,8,32], index: 1, kind: input, shape index: {}]   ;;  %s1861_s2 = inlined_call_operand.vmem [shape: bf16[32,96], index: 2, kind: input, shape index: {}]   ;;  %s1862_s3 = inlined_call_operand.vmem [shape: f32[1,96], index: 3, kind: input, shape index: {}]   ;;  %s1863_s4 = inlined_call_operand.vmem [shape: bf16[32,32], index: 4, kind: input, shape index: {}]   ;;  %s1864_s5 = inlined_call_operand.vmem [shape: f32[1,32], index: 5, kind: input, shape index: {}]   ;;  %s1865_s6 = inlined_call_operand.vmem [shape: f32[1,32], index: 6, kind: input, shape index: {}]   ;;  %s1866_s7 = inlined_call_operand.vmem [shape: f32[1,32], index: 7, kind: input, shape index: {}]   ;;  %s1867_s8 = inlined_call_operand.vmem [shape: bf16[32,64], index: 8, kind: input, shape index: {}]   ;;  %s1868_s9 = inlined_call_operand.vmem [shape: f32[1,64], index: 9, kind: input, shape index: {}]   ;;  %s1869_s10 = inlined_call_operand.vmem [shape: bf16[64,32], index: 10, kind: input, shape index: {}]   ;;  %s1870_s11 = inlined_call_operand.vmem [shape: f32[1,32], index: 11, kind: input, shape index: {}]   ;;  %s1871_s12 = inlined_call_operand.vmem [shape: f32[1,32], index: 12, kind: input, shape index: {}]   ;;  %s1872_s13 = inlined_call_operand.vmem [shape: f32[1,32], index: 13, kind: input, shape index: {}]   ;;  %s1873_s14 = inlined_call_operand.vmem [shape: bf16[2,8,32], index: 14, kind: output, shape index: {}]  }
   0x1 LB: > { %s1377_s30 = sadd.s32 4294967295, %s1592_s29   ;;  %p1381_p0 = scmp.ge.s32.totalorder %s1592_s29, 1  ;;  %s1592_s29 = sphi %s1685_s29, %s24_s29  }
   0x2   : > { %p419_p1 = scmp.lt.s32.totalorder %s1592_s29, 3 }
   0x4   : > { %p420_p2 = pnand %p1381_p0, %p419_p1 }
   0x5   : > { %v1554_v0 = vld [vmem:[%s1861_s2] sm:$0xff] (!%p420_p2)   ;;  %v1594_v1 = vmov (!%p420_p2), 0.0   ;;  %v1555_v2 = vld [vmem:[%s1861_s2 + $0x8] sm:$0xff] (!%p420_p2)   ;;  %vm1595_vm0 = vmmov (!%p420_p2), 0   ;;  %p466_p3 = scmp.lt.s32.totalorder (!%p420_p2), %s1377_s30, 1  ;;  %vm503_vm1 = vcmask (!%p420_p2), 261120   ;;  %v604_v24 = vlaneseq (!%p420_p2) }
   0x6   : > { %423 = sbr.rel (%p420_p2) target bundleno = 2586 (0xa1a), region = 76  ;;  %1446 = vmatprep.subr.bf16.mxu0 (!%p420_p2), %v1594_v1  ;;  %1454 = vmatprep.subr.bf16.mxu1 (!%p420_p2), %v1594_v1  ;;  %v1384_v4 = vld [vmem:[%s1862_s3] ss:$0 sm:$0xff] (!%p420_p2)  ;;  %s1596_s25 = smov (!%p420_p2), 120   ;;  %vm555_vm2 = vcmask (!%p420_p2), 64512   ;;  %vm627_vm3 = vcmask (!%p420_p2), 1043456  }
   0x7   : > { %1447 = vmatpush3.bf16.msra.mxu0 (!%p420_p2), %v1554_v0  ;;  %1450 = vmatprep.mubr.msk.bf16.mxu0 (!%p420_p2), %vm1595_vm0, %v1594_v1  ;;  %s1597_s26 = smov (!%p420_p2), 96   ;;  %s1598_s27 = smov (!%p420_p2), 80   ;;  %v605_v26 = vshrl.u32 (!%p420_p2), %v604_v24, 7  ;;  %vm1020_vm4 = vcmask (!%p420_p2), 130048   ;;  %vm1022_vm5 = vcmask (!%p420_p2), 195584   ;;  %vm1238_vm6 = vcmask (!%p420_p2), 523264  }
   0x8   : > { %1448 = vmatprep.subr.bf16.mxu0 (!%p420_p2), %v1594_v1  ;;  %1456 = vmatprep.mubr.msk.bf16.mxu1 (!%p420_p2), %vm1595_vm0, %v1594_v1  ;;  %s1599_s28 = smov (!%p420_p2), 88   ;;  %s1600_s15 = smov (!%p420_p2), 72   ;;  %vm1313_vm7 = vcmask (!%p420_p2), 257024  }
   0x9   : > { %s1601_s16 = smov (!%p420_p2), 112   ;;  %s1602_s17 = smov (!%p420_p2), 104   ;;  %v606_v28 = vsub.s32 (!%p420_p2), 0, %v605_v26 }
   0xa   : > { %s1604_s23 = smov (!%p420_p2), 64   ;;  %s1605_s24 = smov (!%p420_p2), 40  }
   0xb   : > { %1449 = vmatpush3.bf16.msra.mxu0 (!%p420_p2), %v1555_v2  ;;  %s1609_s18 = smov (!%p420_p2), 24  }
   0xc   : > { %1460 = vmatprep.subr.bf16.mxu0 (!%p420_p2), %v1594_v1 }
   0xd   : > { %s1875_s30 = smov (!%p466_p3, %s1377_s30), 1 }
   0xe   : > { %s1382_s19 = sshll.u32 %s1875_s30, 2  ;;  %s468_s21 = scalar_lea.vmem %s1859_s0, %s1875_s30 }
   0xf   : > { %s472_s22 = scalar_lea.vmem %s1860_s1, %s1382_s19  ;;  %v547_v22 = vld [vmem:[%s468_s21] sm:$0x1] }
  0x10   : > { %v1715_v3 = vld [vmem:[%s472_s22] sm:$0xf]  ;;  %v548_v23 = vcvt.s32.f32 %v547_v22  ;;  %s1603_s22 = smov 56  }
  0x11   : > { %1451 = vmatmul.mubr.msk.bf16.vlgmr.msra.gmra.mrb[0].mxu0 %vm503_vm1, %v1715_v3 }
  0x12   : > { %1462 = vmatprep.mubr.msk.bf16.mxu0 %vm1595_vm0, %v1594_v1  ;;  %v549_v25 = vsub.f32 1.0, %v548_v23 }
  0x14   : > { %v550_v27 = vmul.f32 -1e+09, %v549_v25 }
  0x16   : > { %v607_v29 = vrot.slane %v550_v27, %v606_v28 }
  0xe4   : > { %v541_v5 = vpop.f32.mrb[0].mxu0 }
  0xe5   : > { %v542_v6 = vadd.f32 %v1384_v4, %v541_v5  ;;  %v1452_v7 = vpop.f32.mrb[1].mxu0 }
  0xe6   : > { %v544_v8 = vpop.f32.mrb[2].mxu0 }
  0xe7   : > { %v1724_v9 = vpack.c.bf16 %v542_v6, %v542_v6  ;;  %v1453_v10 = vpop.f32.mrb[3].mxu0 }
  0xe9   : > { %671 = vrot.lane.b32.xlu1 %v1724_v9, %s1596_s25  ;;  %553 = vrot.lane.b32.xlu0 %v1724_v9, %s1597_s26  ;;  %s1606_s25 = smov 48   ;;  %s1607_s26 = smov 8  }
  0xed   : > { %785 = vrot.lane.b32.xlu1 %v1724_v9, %s1598_s27  ;;  %673 = vrot.lane.b32.xlu0 %v1724_v9, %s1599_s28 }
  0xf1   : > { %897 = vrot.lane.b32.xlu1 %v1724_v9, %s1600_s15  ;;  %783 = vrot.lane.b32.xlu0 %v1724_v9, %s1601_s16 }
  0xf5   : > { %895 = vrot.lane.b32.xlu0 %v1724_v9, %s1602_s17  ;;  %s1608_s17 = smov 16  }
 0x15b   : > { %v554_v11 = vpop.permute.xlu0 %553  ;;  %v672_v14 = vpop.permute.xlu1 %671 }
 0x15c   : > { %v560_v12 = vsel %vm555_vm2, %v554_v11, 0 }
 0x15d   : > { %1455 = vmatpush3.bf16.xpose.msra.mxu1 %v560_v12 }
 0x15e   : > { %1466 = vmatprep.subr.bf16.mxu1 %v1594_v1 }
 0x15f   : > { %v674_v13 = vpop.permute.xlu0 %673  ;;  %v786_v16 = vpop.permute.xlu1 %785 }
 0x160   : > { %v679_v15 = vsel %vm555_vm2, %v674_v13, 0  ;;  %v791_v17 = vsel %vm555_vm2, %v786_v16, 0 }
 0x163   : > { %v898_v18 = vpop.permute.xlu1 %897  ;;  %v784_v19 = vpop.permute.xlu0 %783 }
 0x164   : > { %1457 = vmatmul.mubr.msk.bf16.vlgmr.msra.gmra.mrb[0].mxu1 %vm555_vm2, %v1724_v9  ;;  %v903_v20 = vsel %vm555_vm2, %v898_v18, 0 }
 0x165   : > { %1467 = vmatpush3.bf16.xpose.msra.mxu1 %v679_v15  ;;  %1468 = vmatprep.mubr.msk.bf16.mxu1 %vm1595_vm0, %v1594_v1 }
 0x166   : > { %1478 = vmatprep.subr.bf16.mxu1 %v1594_v1 }
 0x167   : > { %v896_v21 = vpop.permute.xlu0 %895 }
 0x16c   : > { %1469 = vmatmul.mubr.msk.bf16.vlgmr.msra.gmra.mrb[4].mxu1 %vm555_vm2, %v672_v14 }
 0x16d   : > { %1479 = vmatpush3.bf16.xpose.msra.mxu1 %v791_v17  ;;  %1480 = vmatprep.mubr.msk.bf16.mxu1 %vm1595_vm0, %v1594_v1 }
 0x16e   : > { %1490 = vmatprep.subr.bf16.mxu1 %v1594_v1 }
 0x174   : > { %1481 = vmatmul.mubr.msk.bf16.vlgmr.msra.gmra.mrb[8].mxu1 %vm555_vm2, %v784_v19 }
 0x175   : > { %1491 = vmatpush3.bf16.xpose.msra.mxu1 %v903_v20  ;;  %1492 = vmatprep.mubr.msk.bf16.mxu1 %vm1595_vm0, %v1594_v1 }
 0x176   : > { %1502 = vmatprep.subr.bf16.mxu1 %v1594_v1 }
 0x17c   : > { %1493 = vmatmul.mubr.msk.bf16.vlgmr.msra.gmra.mrb[12].mxu1 %vm555_vm2, %v896_v21 }
 0x17d   : > { %1506 = vmatprep.mubr.msk.bf16.mxu1 %vm1595_vm0, %v1594_v1 }
 0x237   : > { %v596_v30 = vpop.f32.mrb[0].mxu1 }
 0x238   : > { %v602_v31 = vmul.f32 0.35355338, %v596_v30  ;;  %v1458_v32 = vpop.f32.mrb[1].mxu1 }
 0x239   : > { %v599_v33 = vpop.f32.mrb[2].mxu1 }
 0x23a   : > { %v1459_v34 = vpop.f32.mrb[3].mxu1  ;;  %v609_v35 = vadd.f32 %v607_v29, %v602_v31 }
 0x23c   : > { %v610_v36 = vsel %vm555_vm2, %v609_v35, -inf }
 0x23d   : > { %611 = vmax.xlane.f32.xlu1 %v610_v36 }
 0x23f   : > { %v715_v37 = vpop.f32.mrb[4].mxu1 }
 0x240   : > { %v721_v38 = vmul.f32 0.35355338, %v715_v37  ;;  %v1470_v39 = vpop.f32.mrb[5].mxu1 }
 0x241   : > { %v718_v40 = vpop.f32.mrb[6].mxu1 }
 0x242   : > { %v1471_v41 = vpop.f32.mrb[7].mxu1  ;;  %v722_v42 = vadd.f32 %v721_v38, %v607_v29 }
 0x244   : > { %v723_v43 = vsel %vm555_vm2, %v722_v42, -inf }
 0x245   : > { %724 = vmax.xlane.f32.xlu0 %v723_v43 }
 0x247   : > { %v827_v44 = vpop.f32.mrb[8].mxu1 }
 0x248   : > { %v833_v45 = vmul.f32 0.35355338, %v827_v44  ;;  %v1482_v46 = vpop.f32.mrb[9].mxu1 }
 0x249   : > { %v830_v47 = vpop.f32.mrb[10].mxu1 }
 0x24a   : > { %v1483_v48 = vpop.f32.mrb[11].mxu1  ;;  %v834_v49 = vadd.f32 %v833_v45, %v607_v29 }
 0x24b   : > { %v1556_v48 = vld [vmem:[%s1863_s4] sm:$0xff]  }
 0x24c   : > { %v835_v50 = vsel %vm555_vm2, %v834_v49, -inf  ;;  %1503 = vmatpush3.bf16.msra.mxu1 %v1556_v48 }
 0x24d   : > { %836 = vmax.xlane.f32.xlu0 %v835_v50  ;;  %1504 = vmatprep.subr.bf16.mxu1 %v1594_v1 }
 0x24f   : > { %v939_v51 = vpop.f32.mrb[12].mxu1 }
 0x250   : > { %v945_v52 = vmul.f32 0.35355338, %v939_v51  ;;  %v1494_v53 = vpop.f32.mrb[13].mxu1 }
 0x251   : > { %v942_v54 = vpop.f32.mrb[14].mxu1 }
 0x252   : > { %v1495_v55 = vpop.f32.mrb[15].mxu1  ;;  %v946_v56 = vadd.f32 %v945_v52, %v607_v29 }
 0x254   : > { %v947_v57 = vsel %vm555_vm2, %v946_v56, -inf }
 0x255   : > { %948 = vmax.xlane.f32.xlu1 %v947_v57 }
 0x2ca   : > { %v612_v58 = vpop.xlane.xlu1 %611 }
 0x2cb   : > { %v613_v59 = vsub.f32 %v609_v35, %v612_v58 }
 0x2cd   : > { %v614_v60 = vmul.f32 1.442695, %v613_v59 }
 0x2cf   : > { %1564 = vpow2.f32 %v614_v60 }
 0x2d2   : > { %v725_v61 = vpop.xlane.xlu0 %724 }
 0x2d3   : > { %v726_v62 = vsub.f32 %v722_v42, %v725_v61 }
 0x2d5   : > { %v727_v63 = vmul.f32 1.442695, %v726_v62 }
 0x2d7   : > { %1566 = vpow2.f32 %v727_v63 }
 0x2d9   : > { %v1565_v0 = vpop.eup %1564 }
 0x2da   : > { %v837_v2 = vpop.xlane.xlu0 %836  ;;  %v616_v4 = vsel %vm555_vm2, %v1565_v0, 0.0 }
 0x2db   : > { %v838_v5 = vsub.f32 %v834_v49, %v837_v2  ;;  %617 = vadd.xlane.f32.xlu0 %v616_v4  ;;  %v1557_v49 = vld [vmem:[%s1863_s4 + $0x8] sm:$0xff]   ;;  %v1396_v2 = vld [vmem:[%s1864_s5] ss:$0 sm:$0xff]  ;;  %v479_v4 = vunpack.c.l.bf16 %v1715_v3 }
 0x2dc   : > { %1505 = vmatpush3.bf16.msra.mxu1 %v1557_v49  ;;  %v1558_v3 = vld [vmem:[%s1867_s8] sm:$0xff]  }
 0x2dd   : > { %v839_v6 = vmul.f32 1.442695, %v838_v5  ;;  %1518 = vmatprep.subr.bf16.mxu1 %v1594_v1 }
 0x2df   : > { %1568 = vpow2.f32 %v839_v6 }
 0x2e1   : > { %v1567_v7 = vpop.eup %1566 }
 0x2e2   : > { %v729_v8 = vsel %vm555_vm2, %v1567_v7, 0.0  ;;  %v949_v12 = vpop.xlane.xlu1 %948 }
 0x2e3   : > { %730 = vadd.xlane.f32.xlu1 %v729_v8  ;;  %v950_v13 = vsub.f32 %v946_v56, %v949_v12 }
 0x2e5   : > { %v951_v14 = vmul.f32 1.442695, %v950_v13 }
 0x2e7   : > { %1570 = vpow2.f32 %v951_v14 }
 0x2e9   : > { %v1569_v10 = vpop.eup %1568 }
 0x2ea   : > { %v841_v11 = vsel %vm555_vm2, %v1569_v10, 0.0 }
 0x2eb   : > { %842 = vadd.xlane.f32.xlu0 %v841_v11 }
 0x2f1   : > { %v1571_v15 = vpop.eup %1570 }
 0x2f2   : > { %v953_v16 = vsel %vm555_vm2, %v1571_v15, 0.0 }
 0x2f4   : > { %735 = vrot.lane.b32.xlu1 %v1724_v9, %s1603_s22  ;;  %s476_s22 = scalar_lea.vmem %s1873_s14, %s1382_s19 }
 0x301   : > { %622 = vrot.lane.b32.xlu0 %v1724_v9, %s1604_s23 }
 0x305   : > { %959 = vrot.lane.b32.xlu0 %v1724_v9, %s1605_s24 }
 0x318   : > { %954 = vadd.xlane.f32.xlu1 %v953_v16 }
 0x329   : > { %847 = vrot.lane.b32.xlu1 %v1724_v9, %s1606_s25 }
 0x368   : > { %v618_v17 = vpop.xlane.xlu0 %617 }
 0x369   : > { %1572 = vrcp.f32 %v618_v17 }
 0x370   : > { %v731_v18 = vpop.xlane.xlu1 %730 }
 0x371   : > { %1574 = vrcp.f32 %v731_v18  ;;  %v1559_v18 = vld [vmem:[%s1867_s8 + $0x8] sm:$0xff]  }
 0x373   : > { %v1573_v19 = vpop.eup %1572 }
 0x374   : > { %v620_v21 = vmul.f32 %v1573_v19, %v1565_v0  ;;  %v736_v24 = vpop.permute.xlu1 %735 }
 0x375   : > { %v741_v27 = vsel %vm627_vm3, %v736_v24, 0 }
 0x376   : > { %v621_v25 = vpack.c.bf16 %v620_v21, %v620_v21 }
 0x378   : > { %v843_v20 = vpop.xlane.xlu0 %842 }
 0x379   : > { %1576 = vrcp.f32 %v843_v20 }
 0x37b   : > { %v1575_v26 = vpop.eup %1574 }
 0x37c   : > { %v623_v22 = vpop.permute.xlu0 %622  ;;  %v733_v9 = vmul.f32 %v1575_v26, %v1567_v7 }
 0x37d   : > { %v629_v23 = vsel %vm627_vm3, %v623_v22, 0 }
 0x37e   : > { %1461 = vmatpush3.bf16.msra.mxu0 %v629_v23  ;;  %v734_v28 = vpack.c.bf16 %v733_v9, %v733_v9  ;;  %v1400_v23 = vld [vmem:[%s1865_s6] ss:$0 sm:$0xff] }
 0x37f   : > { %1472 = vmatprep.subr.bf16.mxu0 %v1594_v1 }
 0x380   : > { %v960_v34 = vpop.permute.xlu0 %959 }
 0x381   : > { %1463 = vmatmul.mubr.msk.bf16.vlgmr.msra.gmra.mrb[4].mxu0 %vm555_vm2, %v621_v25  ;;  %v965_v36 = vsel %vm627_vm3, %v960_v34, 0  ;;  %v1401_v25 = vld [vmem:[%s1866_s7] ss:$0 sm:$0xff] }
 0x382   : > { %1473 = vmatpush3.bf16.msra.mxu0 %v741_v27  ;;  %1474 = vmatprep.mubr.msk.bf16.mxu0 %vm1595_vm0, %v1594_v1 }
 0x383   : > { %1484 = vmatprep.subr.bf16.mxu0 %v1594_v1  ;;  %v1577_v29 = vpop.eup %1576 }
 0x384   : > { %v845_v31 = vmul.f32 %v1577_v29, %v1569_v10  ;;  %v1561_v29 = vld [vmem:[%s1869_s10 + $0x8] sm:$0xff]  }
 0x386   : > { %v846_v35 = vpack.c.bf16 %v845_v31, %v845_v31  ;;  %v1563_v31 = vld [vmem:[%s1869_s10 + $0x18] sm:$0xff]  }
 0x389   : > { %1475 = vmatmul.mubr.msk.bf16.vlgmr.msra.gmra.mrb[8].mxu0 %vm555_vm2, %v734_v28  ;;  %v1560_v28 = vld [vmem:[%s1869_s10] sm:$0xff]  }
 0x38a   : > { %1486 = vmatprep.mubr.msk.bf16.mxu0 %vm1595_vm0, %v1594_v1 }
 0x3a5   : > { %v955_v30 = vpop.xlane.xlu1 %954 }
 0x3a6   : > { %1578 = vrcp.f32 %v955_v30  ;;  %v1562_v30 = vld [vmem:[%s1869_s10 + $0x10] sm:$0xff]  }
 0x3a9   : > { %v848_v32 = vpop.permute.xlu1 %847 }
 0x3aa   : > { %v853_v33 = vsel %vm627_vm3, %v848_v32, 0  ;;  %v1402_v32 = vld [vmem:[%s1868_s9] ss:$0 sm:$0xff] }
 0x3ab   : > { %1485 = vmatpush3.bf16.msra.mxu0 %v853_v33 }
 0x3ac   : > { %1496 = vmatprep.subr.bf16.mxu0 %v1594_v1 }
 0x3ae   : > { %1487 = vmatmul.mubr.msk.bf16.vlgmr.msra.gmra.mrb[12].mxu0 %vm555_vm2, %v846_v35 }
 0x3af   : > { %1497 = vmatpush3.bf16.msra.mxu0 %v965_v36  ;;  %1498 = vmatprep.mubr.msk.bf16.mxu0 %vm1595_vm0, %v1594_v1 }
 0x3b0   : > { %v1579_v37 = vpop.eup %1578  ;;  %1510 = vmatprep.subr.bf16.mxu0 %v1594_v1 }
 0x3b1   : > { %v957_v38 = vmul.f32 %v1579_v37, %v1571_v15 }
 0x3b3   : > { %v958_v39 = vpack.c.bf16 %v957_v38, %v957_v38 }
 0x3b6   : > { %1499 = vmatmul.mubr.msk.bf16.vlgmr.msra.gmra.mrb[16].mxu0 %vm555_vm2, %v958_v39 }
 0x3b7   : > { %1514 = vmatprep.mubr.msk.bf16.mxu0 %vm1595_vm0, %v1594_v1  ;;  %1511 = vmatpush3.bf16.msra.mxu0 %v1558_v3 }
 0x3b8   : > { %1512 = vmatprep.subr.bf16.mxu0 %v1594_v1 }
 0x3bb   : > { %1513 = vmatpush3.bf16.msra.mxu0 %v1559_v18 }
 0x454   : > { %v665_v40 = vpop.f32.mrb[4].mxu0 }
 0x455   : > { %v1464_v41 = vpop.f32.mrb[5].mxu0 }
 0x456   : > { %v668_v42 = vpop.f32.mrb[6].mxu0 }
 0x457   : > { %v1465_v43 = vpop.f32.mrb[7].mxu0 }
 0x45c   : > { %v777_v44 = vpop.f32.mrb[8].mxu0 }
 0x45d   : > { %1008 = vrot.lane.b32.xlu1 %v777_v44, %s1607_s26  ;;  %v1476_v45 = vpop.f32.mrb[9].mxu0 }
 0x45e   : > { %v780_v46 = vpop.f32.mrb[10].mxu0 }
 0x45f   : > { %v1477_v47 = vpop.f32.mrb[11].mxu0 }
 0x460   : > { %v1406_v47 = vld [vmem:[%s1870_s11] ss:$0 sm:$0xff] }
 0x481   : > { %v889_v50 = vpop.f32.mrb[12].mxu0 }
 0x482   : > { %1012 = vrot.lane.b32.xlu0 %v889_v50, %s1608_s17  ;;  %v1488_v51 = vpop.f32.mrb[13].mxu0 }
 0x483   : > { %v892_v52 = vpop.f32.mrb[14].mxu0 }
 0x484   : > { %v1489_v53 = vpop.f32.mrb[15].mxu0 }
 0x489   : > { %v1001_v54 = vpop.f32.mrb[16].mxu0 }
 0x48a   : > { %1016 = vrot.lane.b32.xlu1 %v1001_v54, %s1609_s18  ;;  %v1500_v55 = vpop.f32.mrb[17].mxu0 }
 0x48b   : > { %v1004_v56 = vpop.f32.mrb[18].mxu0 }
 0x48c   : > { %v1501_v57 = vpop.f32.mrb[19].mxu0 }
 0x4cf   : > { %v1009_v58 = vpop.permute.xlu1 %1008 }
 0x4d0   : > { %v1019_v60 = vsel %vm555_vm2, %v665_v40, %v1009_v58 }
 0x4f4   : > { %v1013_v59 = vpop.permute.xlu0 %1012 }
 0x4f5   : > { %v1021_v61 = vsel %vm1020_vm4, %v1019_v60, %v1013_v59 }
 0x4fc   : > { %v1017_v62 = vpop.permute.xlu1 %1016 }
 0x4fd   : > { %v1023_v63 = vsel %vm1022_vm5, %v1021_v61, %v1017_v62 }
 0x4fe   : > { %v1024_v0 = vpack.c.bf16 %v1023_v63, %v1023_v63 }
 0x500   : > { %1507 = vmatmul.mubr.msk.bf16.vlgmr.msra.gmra.mrb[16].mxu1 %vm503_vm1, %v1024_v0  ;;  %v1412_v0 = vld [vmem:[%s1871_s12] ss:$0 sm:$0xff] }
 0x501   : > { %1526 = vmatprep.mubr.msk.bf16.mxu1 %vm1595_vm0, %v1594_v1  ;;  %1519 = vmatpush3.bf16.msra.mxu1 %v1560_v28 }
 0x502   : > { %1520 = vmatprep.subr.bf16.mxu1 %v1594_v1 }
 0x505   : > { %1521 = vmatpush3.bf16.msra.mxu1 %v1561_v29 }
 0x506   : > { %1522 = vmatprep.subr.bf16.mxu1 %v1594_v1 }
 0x509   : > { %1523 = vmatpush3.bf16.msra.mxu1 %v1562_v30 }
 0x50a   : > { %1524 = vmatprep.subr.bf16.mxu1 %v1594_v1 }
 0x50d   : > { %1525 = vmatpush3.bf16.msra.mxu1 %v1563_v31 }
 0x5d3   : > { %v1085_v5 = vpop.f32.mrb[16].mxu1 }
 0x5d4   : > { %v1086_v6 = vadd.f32 %v1396_v2, %v1085_v5  ;;  %v1508_v7 = vpop.f32.mrb[17].mxu1 }
 0x5d5   : > { %v1088_v8 = vpop.f32.mrb[18].mxu1 }
 0x5d6   : > { %v1509_v10 = vpop.f32.mrb[19].mxu1  ;;  %v1091_v11 = vadd.f32 %v1086_v6, %v479_v4  ;;  %v1413_v4 = vld [vmem:[%s1872_s13] ss:$0 sm:$0xff] }
 0x5d8   : > { %v1092_v12 = vsel %vm503_vm1, %v1091_v11, 0.0 }
 0x5d9   : > { %1093 = vadd.xlane.f32.xlu0 %v1092_v12 }
 0x666   : > { %v1094_v13 = vpop.xlane.xlu0 %1093 }
 0x667   : > { %v1096_v14 = vmul.f32 0.03125, %v1094_v13 }
 0x669   : > { %v1097_v15 = vsub.f32 %v1091_v11, %v1096_v14 }
 0x66b   : > { %v1098_v16 = vmul.f32 %v1097_v15, %v1097_v15 }
 0x66d   : > { %v1099_v17 = vsel %vm503_vm1, %v1098_v16, 0.0 }
 0x66e   : > { %1100 = vadd.xlane.f32.xlu1 %v1099_v17 }
 0x6fb   : > { %v1101_v19 = vpop.xlane.xlu1 %1100 }
 0x6fc   : > { %v1102_v20 = vmul.f32 0.03125, %v1101_v19 }
 0x6fe   : > { %v1103_v21 = vadd.f32 1e-12, %v1102_v20 }
 0x700   : > { %1580 = vrsqrt.f32 %v1103_v21 }
 0x70a   : > { %v1581_v22 = vpop.eup %1580 }
 0x70b   : > { %v1105_v24 = vmul.f32 %v1581_v22, %v1097_v15 }
 0x70d   : > { %v1113_v26 = vmul.f32 %v1400_v23, %v1105_v24 }
 0x70f   : > { %v1121_v27 = vadd.f32 %v1401_v25, %v1113_v26 }
 0x711   : > { %v1122_v9 = vpack.c.bf16 %v1121_v27, %v1121_v27 }
 0x713   : > { %1515 = vmatmul.mubr.msk.bf16.vlgmr.msra.gmra.mrb[20].mxu0 %vm503_vm1, %v1122_v9 }
 0x7e6   : > { %v1183_v33 = vpop.f32.mrb[20].mxu0 }
 0x7e7   : > { %v1184_v34 = vadd.f32 %v1402_v32, %v1183_v33  ;;  %v1516_v35 = vpop.f32.mrb[21].mxu0 }
 0x7e8   : > { %v1186_v36 = vpop.f32.mrb[22].mxu0 }
 0x7e9   : > { %v1189_v37 = vmul.f32 %v1184_v34, %v1184_v34  ;;  %v1517_v38 = vpop.f32.mrb[23].mxu0 }
 0x7eb   : > { %v1190_v39 = vmul.f32 %v1189_v37, %v1184_v34 }
 0x7ed   : > { %v1191_v40 = vmul.f32 0.044715, %v1190_v39 }
 0x7ef   : > { %v1192_v41 = vadd.f32 %v1191_v40, %v1184_v34 }
 0x7f1   : > { %v1193_v42 = vmul.f32 0.7978846, %v1192_v41 }
 0x7f3   : > { %1582 = vtanh.f32 %v1193_v42 }
 0x7fd   : > { %v1583_v1 = vpop.eup %1582 }
 0x7fe   : > { %v1195_v43 = vadd.f32 1.0, %v1583_v1 }
 0x800   : > { %v1196_v44 = vmul.f32 0.5, %v1195_v43 }
 0x802   : > { %v1197_v45 = vmul.f32 %v1196_v44, %v1184_v34 }
 0x804   : > { %v1198_v46 = vpack.c.bf16 %v1197_v45, %v1197_v45 }
 0x806   : > { %1527 = vmatmul.mubr.msk.bf16.vlgmr.msra.gmra.mrb[20].mxu1 %vm1238_vm6, %v1198_v46 }
 0x8d9   : > { %v1276_v48 = vpop.f32.mrb[20].mxu1 }
 0x8da   : > { %v1277_v49 = vadd.f32 %v1406_v47, %v1276_v48  ;;  %v1528_v50 = vpop.f32.mrb[21].mxu1 }
 0x8db   : > { %v1279_v51 = vpop.f32.mrb[22].mxu1 }
 0x8dc   : > { %v1529_v52 = vpop.f32.mrb[23].mxu1  ;;  %v1282_v53 = vadd.f32 %v1277_v49, %v1121_v27 }
 0x8de   : > { %v1283_v54 = vsel %vm503_vm1, %v1282_v53, 0.0 }
 0x8df   : > { %1284 = vadd.xlane.f32.xlu0 %v1283_v54 }
 0x96c   : > { %v1285_v55 = vpop.xlane.xlu0 %1284 }
 0x96d   : > { %v1286_v56 = vmul.f32 0.03125, %v1285_v55 }
 0x96f   : > { %v1287_v57 = vsub.f32 %v1282_v53, %v1286_v56 }
 0x971   : > { %v1288_v58 = vmul.f32 %v1287_v57, %v1287_v57 }
 0x973   : > { %v1289_v59 = vsel %vm503_vm1, %v1288_v58, 0.0 }
 0x974   : > { %1290 = vadd.xlane.f32.xlu0 %v1289_v59 }
 0xa01   : > { %v1291_v60 = vpop.xlane.xlu0 %1290 }
 0xa02   : > { %v1292_v61 = vmul.f32 0.03125, %v1291_v60 }
 0xa04   : > { %v1293_v62 = vadd.f32 1e-12, %v1292_v61 }
 0xa06   : > { %1584 = vrsqrt.f32 %v1293_v62 }
 0xa10   : > { %v1585_v63 = vpop.eup %1584 }
 0xa11   : > { %v1295_v2 = vmul.f32 %v1585_v63, %v1287_v57 }
 0xa13   : > { %v1303_v5 = vmul.f32 %v1412_v0, %v1295_v2 }
 0xa15   : > { %v1311_v6 = vadd.f32 %v1413_v4, %v1303_v5 }
 0xa17   : > { %v1312_v7 = vpack.c.bf16 %v1311_v6, %v1311_v6 }
 0xa19   : > { %1314 = vst.msk [vmem:[%s476_s22] sm:$0xf] %vm1313_vm7, %v1312_v7 }
 0xa1a PF: > { %s24_s29 = sadd.s32 1, %s1592_s29  }
 0xa1b   : > { %p21_p4 = scmp.ge.s32.totalorder %s24_s29, 4  }
 0xa1d   :  { %23 = sbr.rel (!%p21_p4) target bundleno = 1 (0x1), region = 109 }

</bundles_post_ra>
